<compile_context>
chip_gen: v7x
topology: tpu7x:2x2x1
jax: 0.10.0
libtpu: 0.0.40
codegen_flags: <defaults>
</compile_context>

<pallas_src>
import functools

import jax
import jax.numpy as jnp
from jax.experimental import pallas as pl
from jax.experimental.pallas import tpu as pltpu


def _alpha_gnn_kernel(x_ref, a_hbm_ref, w_ref, b_ref, out_ref, a_vmem, dma_sem, *, K):
    """One grid step == one GNN layer t (grid axis 0 is sequential).

    Fused-for-the-MXU formulation (same math as sum_k (A_k @ x) @ W_k + b_k):
        xw[k] = x @ W[t, k]                      (one batched matmul over K)
        h     = A_wide @ concat_k(xw[k])         (one deep-contraction matmul;
                                                  the K-sum is MXU accumulation)
        x     = l2norm(x + relu(h + b_sum[t]))
    """
    Np, Dp = x_ref.shape
    t = pl.program_id(0)

    # t == 0: kick off the one-time A DMA (A is layer-invariant, single-buffered
    # f32 scratch — never re-fetched) and seed the resident output block with
    # the input features. out_ref's block index is constant over t, so it stays
    # in VMEM and carries x across layers (no extra (N,D) scratch).
    @pl.when(t == 0)
    def _():
        pltpu.make_async_copy(a_hbm_ref, a_vmem, dma_sem).start()
        out_ref[...] = x_ref[...]

    x = out_ref[...]                                              # (Np, Dp) f32

    # ---- per-relation linear FIRST (independent of A, so at t==0 this matmul
    # overlaps the in-flight A DMA): xw[k] = x @ W[k], batched over K.
    xb = jnp.broadcast_to(x, (K, Np, Dp))
    xw = jax.lax.dot_general(
        xb, w_ref[...],
        dimension_numbers=(((2,), (1,)), ((0,), (0,))),           # 'knd,kde->kne'
        preferred_element_type=jnp.float32)                       # (K, Np, Dp)
    xw = xw.reshape(K * Np, Dp)                                   # layout-preserving (Np%8==0, Dp%128==0)

    # Only the aggregation needs A -> wait for the t==0 DMA here.
    @pl.when(t == 0)
    def _():
        pltpu.make_async_copy(a_hbm_ref, a_vmem, dma_sem).wait()

    # ---- aggregation + K-reduction in ONE matmul with a deep (K*Np)
    # contraction: h[i] = sum_k sum_j A_k[i, j] * (x @ W_k)[j]  (f32 MXU acc).
    h = jnp.dot(a_vmem[...], xw, preferred_element_type=jnp.float32)   # (Np, Dp)
    h = h + b_ref[...]                                            # pre-summed bias (1, Dp)

    # ---- residual + ReLU + L2 normalize (F.normalize eps = 1e-12).
    x_new = x + jnp.maximum(h, 0.0)
    sq = jnp.sum(x_new * x_new, axis=-1, keepdims=True)
    inv = jax.lax.rsqrt(jnp.maximum(sq, 1e-24))                   # == 1 / max(||x||, 1e-12)
    out_ref[...] = x_new * inv


def alpha_gnn_forward(x, edge_index, edge_attr, W, b, *, num_nodes, alpha, l2norm=True):
    """Runs the full AlphaGNN stage.

    x          : (N, D) float32 node features
    edge_index : (2, E) int32,  row 0 = src, row 1 = dst
    edge_attr  : (E,)   int32 relation id in [1, alpha]
    W          : (T, K, D, D) float32
    b          : (T, K, D)    float32
    """
    del l2norm  # cfg.gnn.l2norm = True is baked into the kernel
    N, D = x.shape
    T, K = W.shape[0], W.shape[1]
    assert K == alpha and N == num_nodes

    # Lane-align BOTH dims: the node dim is the contraction/lane dim of A_wide,
    # the feature dim is the lane dim of x / W / out (unmasked vector stores).
    Np = -(-N // 128) * 128
    Dp = -(-D // 128) * 128

    # ---- glue: dense per-relation adjacency, one scatter, relations concat'd
    # along the contraction axis:  A_wide[i, k*Np + j] = A_k[i, j]   (f32 so the
    # kernel never casts it).
    src = edge_index[0].astype(jnp.int32)
    dst = edge_index[1].astype(jnp.int32)
    valid = (edge_attr >= 1) & (edge_attr <= K)
    k_idx = jnp.clip(edge_attr, 1, K) - 1
    ones = jnp.where(valid, 1.0, 0.0).astype(jnp.float32)
    A = jnp.zeros((K, Np, Np), jnp.float32).at[k_idx, dst, src].add(ones)
    A_wide = jnp.transpose(A, (1, 0, 2)).reshape(Np, K * Np)
    # TODO(synk): for large N (dense resident A exceeds VMEM, esp. v7x's 64 MiB)
    # switch to a row-tiled "parallel" grid axis that streams A blocks from HBM
    # (and shards across v7x's two TensorCores), carrying x via HBM per layer.

    # Fold the "skip relation k if it has no edges" branch into W and b.
    counts = jnp.zeros((K,), jnp.int32).at[k_idx].add(valid.astype(jnp.int32))
    has_edges = (counts > 0).astype(jnp.float32)
    W_eff = W.astype(jnp.float32) * has_edges[None, :, None, None]
    b_sum = (b.astype(jnp.float32) * has_edges[None, :, None]).sum(axis=1)    # (T, D)

    # Zero-pad (semantically transparent: padded rows/cols stay exactly zero).
    x_p = jnp.pad(x.astype(jnp.float32), ((0, Np - N), (0, Dp - D)))
    W_p = jnp.pad(W_eff, ((0, 0), (0, 0), (0, Dp - D), (0, Dp - D)))
    b_p = jnp.pad(b_sum, ((0, 0), (0, Dp - D)))[:, None, :]                   # (T, 1, Dp)

    # VMEM budget: resident f32 A + double-buffered W/b/x/out + intermediates.
    a_bytes = 4 * Np * K * Np
    w_bytes = 4 * K * Dp * Dp
    need = a_bytes + 2 * w_bytes + 4 * 4 * K * Np * Dp + 8 * 4 * Np * Dp
    vmem_limit = int(min(max(need + (8 << 20), 32 << 20), 100 << 20))

    flops = 2 * T * K * Np * Dp * (Np + Dp)
    bytes_accessed = 4 * (Np * K * Np + T * (K * Dp * Dp + Dp) + 2 * Np * Dp)

    kernel = functools.partial(_alpha_gnn_kernel, K=K)
    out = pl.pallas_call(
        kernel,
        out_shape=jax.ShapeDtypeStruct((Np, Dp), jnp.float32),
        grid_spec=pltpu.PrefetchScalarGridSpec(
            num_scalar_prefetch=0,
            grid=(T,),
            in_specs=[
                pl.BlockSpec((Np, Dp), lambda t: (0, 0)),                # x (seed)
                pl.BlockSpec(memory_space=pl.ANY),                       # A_wide in HBM, manual DMA
                pl.BlockSpec((pl.Squeezed(), K, Dp, Dp),
                             lambda t: (t, 0, 0, 0)),                    # W[t]    -> (K, Dp, Dp)
                pl.BlockSpec((pl.Squeezed(), 1, Dp),
                             lambda t: (t, 0, 0)),                       # b_sum[t]-> (1, Dp)
            ],
            out_specs=pl.BlockSpec((Np, Dp), lambda t: (0, 0)),
            scratch_shapes=[
                pltpu.VMEM((Np, K * Np), jnp.float32),                   # resident A (single copy)
                pltpu.SemaphoreType.DMA,                                 # its DMA semaphore
            ],
        ),
        compiler_params=pltpu.CompilerParams(
            dimension_semantics=("arbitrary",),   # layers carry state -> sequential
            vmem_limit_bytes=vmem_limit,
        ),
        cost_estimate=pl.CostEstimate(
            flops=flops, transcendentals=T * Np, bytes_accessed=bytes_accessed),
    )(x_p, A_wide, W_p, b_p)
    return out[:N, :D].astype(x.dtype)


def reference_forward(x, edge_index, edge_attr, W, b, *, alpha):
    """Pure-JAX reference mirroring the PyTorch loop."""
    N, D = x.shape
    T = W.shape[0]
    src, dst = edge_index[0], edge_index[1]
    for t in range(T):
        x_in = x
        h = jnp.zeros_like(x)
        for k in range(1, alpha + 1):
            sel = (edge_attr == k)
            if not bool(jnp.any(sel)):
                continue
            selv = sel.astype(x.dtype)
            Ak = jnp.zeros((N, N), x.dtype).at[dst, src].add(selv)
            h = h + Ak @ x_in @ W[t, k - 1] + b[t, k - 1]
        x = x_in + jax.nn.relu(h)
        nrm = jnp.sqrt(jnp.sum(x * x, axis=-1, keepdims=True))
        x = x / jnp.maximum(nrm, 1e-12)
    return x


if __name__ == "__main__":
    key = jax.random.PRNGKey(0)

    # Small shapes consistent with the module.
    N = 16            # num nodes
    D = 32            # dim_in == dim_out (residual connection requires this)
    num_layers = 3    # T
    k_max = 3
    alpha = min(num_layers, k_max)
    E = 48            # num edges

    k_x, k_src, k_dst, k_attr, k_w, k_b = jax.random.split(key, 6)
    x = jax.random.normal(k_x, (N, D), dtype=jnp.float32)
    edge_index = jnp.stack(
        [
            jax.random.randint(k_src, (E,), 0, N, dtype=jnp.int32),
            jax.random.randint(k_dst, (E,), 0, N, dtype=jnp.int32),
        ],
        axis=0,
    )
    edge_attr = jax.random.randint(k_attr, (E,), 1, alpha + 1, dtype=jnp.int32)

    # Deterministic parameter init (one linear per (layer, hop)).
    W = 0.1 * jax.random.normal(k_w, (num_layers, alpha, D, D), dtype=jnp.float32)
    b = 0.01 * jax.random.normal(k_b, (num_layers, alpha, D), dtype=jnp.float32)

    out = alpha_gnn_forward(
        x, edge_index, edge_attr, W, b, num_nodes=N, alpha=alpha
    )
    out = jax.block_until_ready(out)

    ref = reference_forward(x, edge_index, edge_attr, W, b, alpha=alpha)
    assert out.shape == (N, D)
    assert jnp.allclose(out, ref, atol=1e-4, rtol=1e-4), (
        f"max abs diff = {jnp.max(jnp.abs(out - ref))}"
    )
    print("KERNEL_OK")
</pallas_src>

<mosaic_0001>
module attributes {stable_mosaic.version = 11 : i64} {
  func.func @_alpha_gnn_kernel(%arg0: i32, %arg1: memref<128x128xf32, #tpu.memory_space<vmem>>, %arg2: memref<128x384xf32, #tpu.memory_space<any>>, %arg3: memref<1x3x128x128xf32, #tpu.memory_space<vmem>>, %arg4: memref<1x1x128xf32, #tpu.memory_space<vmem>>, %arg5: memref<128x128xf32, #tpu.memory_space<vmem>>, %arg6: memref<128x384xf32, #tpu.memory_space<vmem>>, %arg7: memref<!tpu.dma_semaphore, #tpu.memory_space<semaphore_mem>>) attributes {dimension_semantics = [#tpu.dimension_semantics<arbitrary>], iteration_bounds = array<i64: 3>, scalar_prefetch = 0 : i64, scratch_operands = 2 : i64, tpu.core_type = #tpu.core_type<tc>, window_params = [{pipeline_mode = #tpu.pipeline_mode<synchronous>, transform_indices = @transform_0, window_bounds = array<i64: 128, 128>}, {}, {transform_indices = @transform_2, window_bounds = array<i64: 1, 3, 128, 128>}, {transform_indices = @transform_3, window_bounds = array<i64: 1, 1, 128>}, {pipeline_mode = #tpu.pipeline_mode<synchronous>, transform_indices = @transform_4, window_bounds = array<i64: 128, 128>}]} {
    %c0_i32 = arith.constant 0 : i32
    %0 = arith.cmpi eq, %arg0, %c0_i32 : i32
    %1 = arith.extui %0 : i1 to i32
    %c0_i32_0 = arith.constant 0 : i32
    %2 = arith.cmpi ne, %1, %c0_i32_0 : i32
    scf.if %2 {
      tpu.enqueue_dma source(%arg2 : memref<128x384xf32, #tpu.memory_space<any>>) target(%arg6 : memref<128x384xf32, #tpu.memory_space<vmem>>) target_semaphore(%arg7 : memref<!tpu.dma_semaphore, #tpu.memory_space<semaphore_mem>>)
      %c0_19 = arith.constant 0 : index
      %c0_20 = arith.constant 0 : index
      %31 = vector.load %arg1[%c0_19, %c0_20] : memref<128x128xf32, #tpu.memory_space<vmem>>, vector<128x128xf32>
      %c0_21 = arith.constant 0 : index
      %c0_22 = arith.constant 0 : index
      %32 = vector.load %arg5[%c0_21, %c0_22] : memref<128x128xf32, #tpu.memory_space<vmem>>, vector<128x128xf32>
      tpu.vector_store %arg5[%c0_21, %c0_22], %31 {strides = array<i32>} : memref<128x128xf32, #tpu.memory_space<vmem>>, vector<128x128xf32>,
    } else {
    }
    %c0 = arith.constant 0 : index
    %c0_1 = arith.constant 0 : index
    %3 = vector.load %arg5[%c0, %c0_1] : memref<128x128xf32, #tpu.memory_space<vmem>>, vector<128x128xf32>
    %4 = vector.shape_cast %3 : vector<128x128xf32> to vector<1x128x128xf32>
    %5 = vector.broadcast %4 : vector<1x128x128xf32> to vector<3x128x128xf32>
    %c0_2 = arith.constant 0 : index
    %c0_3 = arith.constant 0 : index
    %c0_4 = arith.constant 0 : index
    %c0_5 = arith.constant 0 : index
    %6 = vector.load %arg3[%c0_2, %c0_3, %c0_4, %c0_5] : memref<1x3x128x128xf32, #tpu.memory_space<vmem>>, vector<1x3x128x128xf32>
    %7 = vector.shape_cast %6 : vector<1x3x128x128xf32> to vector<3x128x128xf32>
    %cst = arith.constant dense<0.000000e+00> : vector<3x128x128xf32>
    %8 = tpu.matmul %5, %7, %cst {dimension_numbers = #tpu.dot_dimension_numbers<[2], [1], [1], [2], [0, 0, 0, 1, 1, 2], [0], [0]>} : vector<3x128x128xf32>, vector<3x128x128xf32>, vector<3x128x128xf32> -> vector<3x128x128xf32>
    %9 = vector.shape_cast %8 : vector<3x128x128xf32> to vector<384x128xf32>
    %c0_i32_6 = arith.constant 0 : i32
    %10 = arith.cmpi eq, %arg0, %c0_i32_6 : i32
    %11 = arith.extui %10 : i1 to i32
    %c0_i32_7 = arith.constant 0 : i32
    %12 = arith.cmpi ne, %11, %c0_i32_7 : i32
    scf.if %12 {
      tpu.wait_dma2 semaphore(%arg7 : memref<!tpu.dma_semaphore, #tpu.memory_space<semaphore_mem>>) src(%arg2 : memref<128x384xf32, #tpu.memory_space<any>>) dst(%arg6 : memref<128x384xf32, #tpu.memory_space<vmem>>)
    } else {
    }
    %c0_8 = arith.constant 0 : index
    %c0_9 = arith.constant 0 : index
    %13 = vector.load %arg6[%c0_8, %c0_9] : memref<128x384xf32, #tpu.memory_space<vmem>>, vector<128x384xf32>
    %cst_10 = arith.constant dense<0.000000e+00> : vector<128x128xf32>
    %14 = tpu.matmul %13, %9, %cst_10 {dimension_numbers = #tpu.dot_dimension_numbers<[1], [0], [0], [1], [0, 0, 1, 1], [], []>} : vector<128x384xf32>, vector<384x128xf32>, vector<128x128xf32> -> vector<128x128xf32>
    %c0_11 = arith.constant 0 : index
    %c0_12 = arith.constant 0 : index
    %c0_13 = arith.constant 0 : index
    %15 = vector.load %arg4[%c0_11, %c0_12, %c0_13] : memref<1x1x128xf32, #tpu.memory_space<vmem>>, vector<1x1x128xf32>
    %16 = vector.shape_cast %15 : vector<1x1x128xf32> to vector<1x128xf32>
    %17 = vector.broadcast %16 : vector<1x128xf32> to vector<128x128xf32>
    %18 = arith.addf %14, %17 : vector<128x128xf32>
    %cst_14 = arith.constant 0.000000e+00 : f32
    %19 = vector.broadcast %cst_14 : f32 to vector<128x128xf32>
    %20 = arith.maximumf %18, %19 : vector<128x128xf32>
    %21 = arith.addf %3, %20 : vector<128x128xf32>
    %22 = arith.mulf %21, %21 : vector<128x128xf32>
    %cst_15 = arith.constant dense<0.000000e+00> : vector<128xf32>
    %23 = vector.multi_reduction <add>, %22, %cst_15 [1] : vector<128x128xf32> to vector<128xf32>
    %24 = vector.shape_cast %23 : vector<128xf32> to vector<128x1xf32>
    %cst_16 = arith.constant 1.000000e-24 : f32
    %25 = vector.broadcast %cst_16 : f32 to vector<128x1xf32>
    %26 = arith.maximumf %24, %25 : vector<128x1xf32>
    %27 = math.rsqrt %26 : vector<128x1xf32>
    %28 = vector.broadcast %27 : vector<128x1xf32> to vector<128x128xf32>
    %29 = arith.mulf %21, %28 : vector<128x128xf32>
    %c0_17 = arith.constant 0 : index
    %c0_18 = arith.constant 0 : index
    %30 = vector.load %arg5[%c0_17, %c0_18] : memref<128x128xf32, #tpu.memory_space<vmem>>, vector<128x128xf32>
    tpu.vector_store %arg5[%c0_17, %c0_18], %29 {strides = array<i32>} : memref<128x128xf32, #tpu.memory_space<vmem>>, vector<128x128xf32>,
    return
  }
  func.func @transform_0(%arg0: i32) -> (i32, i32) {
    %c0_i32 = arith.constant 0 : i32
    %c0_i32_0 = arith.constant 0 : i32
    %c0_i32_1 = arith.constant 0 : i32
    return %c0_i32, %c0_i32_0 : i32, i32
  }
  func.func @transform_2(%arg0: i32) -> (i32, i32, i32, i32) {
    %c0_i32 = arith.constant 0 : i32
    %c0_i32_0 = arith.constant 0 : i32
    %c0_i32_1 = arith.constant 0 : i32
    %c0_i32_2 = arith.constant 0 : i32
    return %arg0, %c0_i32, %c0_i32_0, %c0_i32_1 : i32, i32, i32, i32
  }
  func.func @transform_3(%arg0: i32) -> (i32, i32, i32) {
    %c0_i32 = arith.constant 0 : i32
    %c0_i32_0 = arith.constant 0 : i32
    %c0_i32_1 = arith.constant 0 : i32
    return %arg0, %c0_i32, %c0_i32_0 : i32, i32, i32
  }
  func.func @transform_4(%arg0: i32) -> (i32, i32) {
    %c0_i32 = arith.constant 0 : i32
    %c0_i32_0 = arith.constant 0 : i32
    %c0_i32_1 = arith.constant 0 : i32
    return %c0_i32, %c0_i32_0 : i32, i32
  }
}

</mosaic_0001>

<bundles_post_ra>
// kernel: tpu_custom_call.1
= control target key start
LH: loop header
LB: loop body
LE: loop exit
PB: predicated region body
PF: predicated region fallthrough
CT: control target
= control target key end

     0   :  { %9 = vsyncpa [#allocation5], 0  ;;  %s2749_s0 = inlined_call_operand.hbm [shape: f32[128,128], index: 0, kind: input, shape index: {}]   ;;  %s2750_s1 = inlined_call_operand.hbm [shape: f32[128,384], index: 1, kind: input, shape index: {}]   ;;  %s2751_s2 = inlined_call_operand.hbm [shape: f32[3,3,128,128], index: 2, kind: input, shape index: {}]   ;;  %s2752_s3 = inlined_call_operand.vmem [shape: f32[3,1,128], index: 3, kind: input, shape index: {}]   ;;  %s2753_s4 = inlined_call_operand.hbm [shape: f32[128,128], index: 4, kind: output, shape index: {}]  }
   0x1   :  { %10 = vsyncpa [#allocation8], 0 }
   0x2   :  { %12 = vsyncpa [#allocation8 + $0x1], 0 }
   0x3   :  { %13 = vsyncpa [#allocation6], 0  ;;  %s2229_s15 = smov 0   ;;  %s2231_s16 = smov 0  }
   0x4   :  { %s2233_s17 = smov 0   ;;  %s2235_s18 = smov 0  }
   0x5 LB: > { %s2248_s19 = sadd.s32 4294967295, %s2194_s18   ;;  %p60_p0 = scmp.ne.s32.totalorder %s2186_s16, %s2182_s15  ;;  %s2194_s18 = sphi %s2235_s18, %s2795_s18   ;;  %s2190_s17 = sphi %s2233_s17, %s2794_s17   ;;  %s2186_s16 = sphi %s2231_s16, %s2793_s16   ;;  %s2182_s15 = sphi %s2229_s15, %s2792_s15  }
   0x6   : > { %p2754_p1 = scmp.eq.s32.totalorder %s2248_s19, 0  ;;  %p1336_p2 = scmp.ge.s32.totalorder %s2194_s18, 1 }
   0x7   : > { %p118_p3 = scmp.lt.s32.totalorder %s2194_s18, 4  ;;  %s2196_s22 = smov [#allocation4]  }
   0x8   : > { %p2257_p5 = por %p2754_p1, %p60_p0  ;;  %s130_s23 = sshll.u32 %s2196_s22, 4  ;;  %s131_s23 = int_to_ptr.vmem [resolvable:$true] %s130_s23 }
   0x9   : > { %p2261_p6 = pnand %p1336_p2, %p118_p3  ;;  %s2274_s25 = sadd.s32 1, %s2194_s18  }
   0xa   : > { %s2765_s20 = scalar_select %p2257_p5, 1, 0 }
   0xb   : > { %s2766_s21 = scalar_select %p2261_p6, 1, 0 }
   0xc   : > { %p1957_p7 = pneg %p2261_p6  ;;  %s47_s26 = sadd.s32 1, %s2190_s17 }
   0xd   : > { %s44_s27 = ssub.s32 %s2194_s18, %s2274_s25  ;;  %s2042_s30 = scalar_lea.hbm %s2749_s0, 2048 }
   0xe   : > { %p2269_p8 = pnand %p1957_p7, %p2754_p1  ;;  %p2043_p9 = scmp.ne.s32.totalorder %s2749_s0, %s2042_s30 }
   0xf   : > { %p2049_p13 = scmp.lt.u32.totalorder %s2042_s30, %s2749_s0 }
  0x10   : > { %p2044_p10 = pneg %p2269_p8 }
  0x12   : > { %p2045_p11 = pnand %p2044_p10, %p2043_p9 }
  0x14   : > { %p2046_p12 = pneg %p2045_p11 }
  0x16   : > { %p2051_p0 = pnand %p2049_p13, %p2046_p12 }
  0x18   : > { %2054 = shalt.err (!%p2051_p0)
}
  0x19   : > { %s2055_s9 = scalar_lea.vmem %s131_s23, 2048  ;;  %p2063_p4 = scmp.lt.s32.totalorder %s131_s23, %s131_s23 }
  0x1a   : > { %p2056_p2 = scmp.ne.s32.totalorder %s131_s23, %s2055_s9  ;;  %p2064_p1 = scmp.lt.s32.totalorder %s2055_s9, %s2055_s9 }
  0x1c   : > { %p2058_p3 = pnand %p2056_p2, %p2044_p10  ;;  %p2065_p5 = por %p2064_p1, %p2063_p4 }
  0x1e   : > { %p2059_p7 = pneg %p2058_p3 }
  0x20   : > { %p2066_p6 = pnand %p2065_p5, %p2059_p7 }
  0x22   : > { %2069 = shalt.err (!%p2066_p6)
}
  0x23   : > { %s2197_s10 = smov 128   ;;  %s2198_s11 = smov 8  }
  0x24   : > { %1960 = dma.hbm_to_vmem [thread:$0]  (!%p2269_p8), %s2749_s0, 2048, %s131_s23, [#allocation5], %s2197_s10, %s2197_s10, %s2198_s11  }
  0x25   : > { %p45_p1 = scmp.eq.s32.totalorder %s44_s27, 0  ;;  %p54_p4 = scmp.ne.s32.totalorder %s2190_s17, %s2186_s16 }
  0x26   : > { %p55_p5 = scmp.eq.s32.totalorder %s2194_s18, 0  ;;  %p1966_p6 = scmp.lt.s32.totalorder %s2194_s18, 3 }
  0x27   : > { %s2303_s14 = scalar_select %p45_p1, %s2190_s17, %s47_s26  }
  0x28   : > { %p56_p9 = por %p55_p5, %p54_p4  ;;  %s144_s15 = sand.u32 1, %s2190_s17  }
  0x29   : > { %s1942_s22 = smul.u32 384, %s144_s15  ;;  %s2075_s8 = scalar_lea.hbm %s2751_s2, 18432 }
  0x2a   : > { %s1943_s28 = smul.u32 6144, %s2194_s18  ;;  %p2307_p10 = pnand %p1966_p6, %p56_p9 }
  0x2b   : > { %s148_s26 = scalar_lea.vmem [#allocation7], %s1942_s22  ;;  %s2318_s18 = scalar_lea.sflag [#allocation8], %s144_s15 }
  0x2c   : > { %s2314_s23 = scalar_lea.hbm %s2751_s2, %s1943_s28  ;;  %s155_s27 = sshll.u32 %s148_s26, 4  ;;  %s2316_s27 = int_to_ptr.vmem [resolvable:$true] %s155_s27 }
  0x2d   : > { %s2070_s5 = scalar_lea.hbm %s2314_s23, 6144  ;;  %p2072_p11 = pneg %p2307_p10 }
  0x2e   : > { %p2071_p8 = scmp.ne.s32.totalorder %s2314_s23, %s2070_s5  ;;  %p2076_p0 = scmp.lt.u32.totalorder %s2314_s23, %s2751_s2 }
  0x2f   : > { %p2077_p2 = scmp.lt.u32.totalorder %s2075_s8, %s2070_s5  ;;  %p2079_p7 = scmp.lt.u32.totalorder %s2070_s5, %s2314_s23 }
  0x30   : > { %p2073_p12 = pnand %p2072_p11, %p2071_p8 }
  0x31   : > { %p2078_p3 = por %p2077_p2, %p2076_p0 }
  0x32   : > { %p2074_p13 = pneg %p2073_p12 }
  0x33   : > { %p2080_p1 = por %p2079_p7, %p2078_p3 }
  0x35   : > { %p2081_p4 = pnand %p2080_p1, %p2074_p13 }
  0x37   : > { %2084 = shalt.err (!%p2081_p4)
}
  0x38   : > { %s2085_s13 = scalar_lea.vmem %s2316_s27, 6144  ;;  %s2199_s15 = smov [#allocation7]  }
  0x39   : > { %p2086_p5 = scmp.ne.s32.totalorder %s2316_s27, %s2085_s13  ;;  %s2090_s22 = sshll.u32 %s2199_s15, 4  ;;  %s2091_s22 = int_to_ptr.vmem [resolvable:$false] %s2090_s22 }
  0x3a   : > { %s2092_s28 = scalar_lea.vmem %s2091_s22, 12288  ;;  %p2093_p8 = scmp.lt.s32.totalorder %s2316_s27, %s2091_s22 }
  0x3b   : > { %p2088_p6 = pnand %p2086_p5, %p2072_p11  ;;  %p2094_p12 = scmp.lt.s32.totalorder %s2092_s28, %s2085_s13 }
  0x3d   : > { %p2089_p9 = pneg %p2088_p6  ;;  %p2095_p0 = por %p2094_p12, %p2093_p8 }
  0x3f   : > { %p2096_p2 = pnand %p2095_p0, %p2089_p9 }
  0x41   : > { %2099 = shalt.err (!%p2096_p2)
}
  0x42   : > { %1964 = dma.hbm_to_vmem [thread:$0]  (!%p2307_p10), %s2314_s23, 6144, %s2316_s27, %s2318_s18, %s2197_s10, %s2197_s10, %s2198_s11  }
  0x43   : > { %p2769_p11 = scmp.ne.s32.totalorder %s2766_s21, 0 }
  0x45   : > { %173 = sbr.rel (%p2769_p11) target bundleno = 907 (0x38b), region = 32 }
  0x4c   : > { %p2770_p13 = scmp.eq.s32.totalorder %s2248_s19, 0 }
  0x4e   : > { %2165 = dma.done.wait (%p2770_p13), [#allocation5], 2048   ;;  %p2771_p3 = pmov %p2770_p13 }
  0x4f   : > { %s179_s24 = sand.u32 1, %s2186_s16   ;;  %p2772_p7 = scmp.ne.s32.totalorder %s2765_s20, 0 }
  0x50   : > { %2167 = vsyncadd (%p2771_p3), [#allocation5], 4294965248  ;;  %s1944_s29 = smul.u32 384, %s179_s24  ;;  %s180_s30 = scalar_lea.sflag [#allocation8], %s179_s24 }
  0x52   : > { %s2356_s26 = scalar_lea.vmem [#allocation7], %s1944_s29 }
  0x53   : > { %2169 = dma.done.wait (%p2772_p7), %s180_s30, 6144  }
  0x54   : > { %2171 = vsyncadd (%p2772_p7), %s180_s30, 4294961152  ;;  %p204_p10 = scmp.lt.s32.totalorder %s2248_s19, 2  ;;  %p2773_p1 = scmp.ne.s32.totalorder %s2248_s19, 0 }
  0x55   : > { %v222_v0 = vld [vmem:[#allocation4] sm:$0xff] (!%p2773_p1)  ;;  %v223_v1 = vld [vmem:[#allocation4 + $0x8] sm:$0xff] (!%p2773_p1)  ;;  %v224_v2 = vld [vmem:[#allocation4 + $0x10] sm:$0xff] (!%p2773_p1)  ;;  %s2200_s27 = smov (!%p2773_p1), [#allocation2]   ;;  %s2100_s6 = scalar_lea.hbm (!%p2773_p1), %s2750_s1, 6144 }
  0x56   : > { %s2364_s21 = scalar_select %p204_p10, %s2248_s19, 2 }
  0x57   : > { %210 = sbr.rel (%p2773_p1) target bundleno = 108 (0x6c), region = 44  ;;  %s218_s18 = sshll.u32 (!%p2773_p1), %s2200_s27, 4  ;;  %238 = vst [vmem:[#allocation9] sm:$0xff] (!%p2773_p1), %v222_v0  ;;  %239 = vst [vmem:[#allocation9 + $0x8] sm:$0xff] (!%p2773_p1), %v223_v1  ;;  %v225_v3 = vld [vmem:[#allocation4 + $0x18] sm:$0xff] (!%p2773_p1)  ;;  %v226_v4 = vld [vmem:[#allocation4 + $0x20] sm:$0xff] (!%p2773_p1)  ;;  %s219_s18 = int_to_ptr.vmem [resolvable:$true] %s218_s18 }
  0x58   : > { %s206_s23 = scalar_lea.vmem %s2752_s3, %s2364_s21  ;;  %240 = vst [vmem:[#allocation9 + $0x10] sm:$0xff] (!%p2773_p1), %v224_v2  ;;  %v227_v5 = vld [vmem:[#allocation4 + $0x28] sm:$0xff] (!%p2773_p1)  ;;  %241 = vst [vmem:[#allocation9 + $0x18] sm:$0xff] (!%p2773_p1), %v225_v3  ;;  %v228_v6 = vld [vmem:[#allocation4 + $0x30] sm:$0xff] (!%p2773_p1)  ;;  %p2101_p4 = scmp.ne.s32.totalorder (!%p2773_p1), %s2750_s1, %s2100_s6 }
  0x59   : > { %242 = vst [vmem:[#allocation9 + $0x20] sm:$0xff] (!%p2773_p1), %v226_v4  ;;  %243 = vst [vmem:[#allocation9 + $0x28] sm:$0xff] (!%p2773_p1), %v227_v5  ;;  %v229_v7 = vld [vmem:[#allocation4 + $0x38] sm:$0xff] (!%p2773_p1)  ;;  %v230_v8 = vld [vmem:[#allocation4 + $0x40] sm:$0xff] (!%p2773_p1)  ;;  %p2104_p5 = scmp.lt.u32.totalorder (!%p2773_p1), %s2100_s6, %s2750_s1 }
  0x5b   : > { %p2106_p6 = pnand (!%p2773_p1), %p2104_p5, %p2101_p4 }
  0x5e   : > { %2109 = shalt.err (!%p2106_p6)  }
  0x5f   : > { %s2110_s13 = scalar_lea.vmem %s219_s18, 6144  ;;  %p2115_p8 = scmp.lt.s32.totalorder %s219_s18, %s219_s18 }
  0x60   : > { %p2111_p9 = scmp.ne.s32.totalorder %s219_s18, %s2110_s13  ;;  %p2116_p12 = scmp.lt.s32.totalorder %s2110_s13, %s2110_s13 }
  0x62   : > { %p2117_p0 = por %p2116_p12, %p2115_p8 }
  0x64   : > { %p2118_p2 = pnand %p2117_p0, %p2111_p9 }
  0x66   : > { %2121 = shalt.err (!%p2118_p2)  }
  0x67   : > { %221 = dma.hbm_to_vmem [thread:$0]  %s2750_s1, 6144, %s219_s18, [#allocation3]  ;;  %244 = vst [vmem:[#allocation9 + $0x30] sm:$0xff] %v228_v6  ;;  %245 = vst [vmem:[#allocation9 + $0x38] sm:$0xff] %v229_v7  ;;  %v231_v9 = vld [vmem:[#allocation4 + $0x48] sm:$0xff]  ;;  %v232_v10 = vld [vmem:[#allocation4 + $0x50] sm:$0xff] }
  0x68   : > { %246 = vst [vmem:[#allocation9 + $0x40] sm:$0xff] %v230_v8  ;;  %v233_v11 = vld [vmem:[#allocation4 + $0x58] sm:$0xff]  ;;  %247 = vst [vmem:[#allocation9 + $0x48] sm:$0xff] %v231_v9  ;;  %v234_v12 = vld [vmem:[#allocation4 + $0x60] sm:$0xff] }
  0x69   : > { %248 = vst [vmem:[#allocation9 + $0x50] sm:$0xff] %v232_v10  ;;  %249 = vst [vmem:[#allocation9 + $0x58] sm:$0xff] %v233_v11  ;;  %v235_v13 = vld [vmem:[#allocation4 + $0x68] sm:$0xff]  ;;  %v236_v14 = vld [vmem:[#allocation4 + $0x70] sm:$0xff] }
  0x6a   : > { %250 = vst [vmem:[#allocation9 + $0x60] sm:$0xff] %v234_v12  ;;  %251 = vst [vmem:[#allocation9 + $0x68] sm:$0xff] %v235_v13  ;;  %v237_v15 = vld [vmem:[#allocation4 + $0x78] sm:$0xff] }
  0x6b   : > { %252 = vst [vmem:[#allocation9 + $0x70] sm:$0xff] %v236_v14  ;;  %253 = vst [vmem:[#allocation9 + $0x78] sm:$0xff] %v237_v15 }
  0x6c PF: > { %v270_v16 = vld [vmem:[%s2356_s26] sm:$0xff]  ;;  %v271_v17 = vld [vmem:[%s2356_s26 + $0x8] sm:$0xff]  ;;  %v272_v18 = vld [vmem:[%s2356_s26 + $0x10] sm:$0xff]  ;;  %p2782_p11 = scmp.eq.s32.totalorder %s2248_s19, 0 }
  0x6d   : > { %v1782_v19 = vpack.c.bf16 %v271_v17, %v270_v16  ;;  %v273_v20 = vld [vmem:[%s2356_s26 + $0x18] sm:$0xff]  ;;  %v274_v22 = vld [vmem:[%s2356_s26 + $0x20] sm:$0xff]  ;;  %v275_v23 = vld [vmem:[%s2356_s26 + $0x28] sm:$0xff] }
  0x6e   : > { %v1786_v21 = vpack.c.bf16 %v273_v20, %v272_v18  ;;  %v1790_v24 = vpack.c.bf16 %v275_v23, %v274_v22  ;;  %v276_v25 = vld [vmem:[%s2356_s26 + $0x30] sm:$0xff]  ;;  %v2391_v26 = vld [vmem:[#allocation9] sm:$0xff]  ;;  %v277_v27 = vld [vmem:[%s2356_s26 + $0x38] sm:$0xff] }
  0x6f   : > { %1783 = vmatprep.subr.bf16.mxu0 %v1782_v19  ;;  %1590 = vmatprep.mubr.f32.mxu0 %v2391_v26  ;;  %v286_v28 = vld [vmem:[%s2356_s26 + $0x80] sm:$0xff]  ;;  %v287_v29 = vld [vmem:[%s2356_s26 + $0x88] sm:$0xff]  ;;  %v288_v31 = vld [vmem:[%s2356_s26 + $0x90] sm:$0xff]  ;;  %v1794_v33 = vpack.c.bf16 %v277_v27, %v276_v25 }
  0x70   : > { %1785 = vmatpush3.bf16.msra.mxu0 %v1782_v19  ;;  %1646 = vmatprep.mubr.f32.mxu1 %v2391_v26  ;;  %v1814_v30 = vpack.c.bf16 %v287_v29, %v286_v28  ;;  %v289_v32 = vld [vmem:[%s2356_s26 + $0x98] sm:$0xff]  ;;  %v278_v34 = vld [vmem:[%s2356_s26 + $0x40] sm:$0xff]  ;;  %v279_v36 = vld [vmem:[%s2356_s26 + $0x48] sm:$0xff] }
  0x71   : > { %1787 = vmatprep.subr.bf16.mxu0 %v1786_v21  ;;  %v1818_v35 = vpack.c.bf16 %v289_v32, %v288_v31  ;;  %v290_v37 = vld [vmem:[%s2356_s26 + $0xa0] sm:$0xff]  ;;  %v291_v38 = vld [vmem:[%s2356_s26 + $0xa8] sm:$0xff]  ;;  %v292_v40 = vld [vmem:[%s2356_s26 + $0xb0] sm:$0xff]  ;;  %v1798_v42 = vpack.c.bf16 %v279_v36, %v278_v34 }
  0x72   : > { %1815 = vmatprep.subr.bf16.mxu1 %v1814_v30  ;;  %v1822_v39 = vpack.c.bf16 %v291_v38, %v290_v37  ;;  %v293_v41 = vld [vmem:[%s2356_s26 + $0xb8] sm:$0xff]  ;;  %v280_v43 = vld [vmem:[%s2356_s26 + $0x50] sm:$0xff]  ;;  %v294_v46 = vld [vmem:[%s2356_s26 + $0xc0] sm:$0xff] }
  0x73   : > { %1817 = vmatpush3.bf16.msra.mxu1 %v1814_v30  ;;  %v281_v44 = vld [vmem:[%s2356_s26 + $0x58] sm:$0xff]  ;;  %v1826_v45 = vpack.c.bf16 %v293_v41, %v292_v40  ;;  %v295_v47 = vld [vmem:[%s2356_s26 + $0xc8] sm:$0xff]  ;;  %v282_v49 = vld [vmem:[%s2356_s26 + $0x60] sm:$0xff] }
  0x74   : > { %1789 = vmatpush3.bf16.msra.mxu0 %v1786_v21  ;;  %1819 = vmatprep.subr.bf16.mxu1 %v1818_v35  ;;  %v1802_v48 = vpack.c.bf16 %v281_v44, %v280_v43  ;;  %v283_v50 = vld [vmem:[%s2356_s26 + $0x68] sm:$0xff]  ;;  %v1830_v51 = vpack.c.bf16 %v295_v47, %v294_v46  ;;  %v296_v52 = vld [vmem:[%s2356_s26 + $0xd0] sm:$0xff]  ;;  %v297_v53 = vld [vmem:[%s2356_s26 + $0xd8] sm:$0xff] }
  0x75   : > { %1791 = vmatprep.subr.bf16.mxu0 %v1790_v24  ;;  %v1806_v54 = vpack.c.bf16 %v283_v50, %v282_v49  ;;  %v284_v55 = vld [vmem:[%s2356_s26 + $0x70] sm:$0xff]  ;;  %v285_v56 = vld [vmem:[%s2356_s26 + $0x78] sm:$0xff]  ;;  %v1834_v57 = vpack.c.bf16 %v297_v53, %v296_v52  ;;  %v298_v58 = vld [vmem:[%s2356_s26 + $0xe0] sm:$0xff] }
  0x76   : > { %v299_v59 = vld [vmem:[%s2356_s26 + $0xe8] sm:$0xff]  ;;  %v1810_v60 = vpack.c.bf16 %v285_v56, %v284_v55  ;;  %v302_v61 = vld [vmem:[%s2356_s26 + $0x100] sm:$0xff]  ;;  %v300_v0 = vld [vmem:[%s2356_s26 + $0xf0] sm:$0xff] }
  0x77   : > { %1821 = vmatpush3.bf16.msra.mxu1 %v1818_v35  ;;  %v303_v62 = vld [vmem:[%s2356_s26 + $0x108] sm:$0xff]  ;;  %v1838_v63 = vpack.c.bf16 %v299_v59, %v298_v58  ;;  %v301_v1 = vld [vmem:[%s2356_s26 + $0xf8] sm:$0xff]  ;;  %v304_v3 = vld [vmem:[%s2356_s26 + $0x110] sm:$0xff] }
  0x78   : > { %1793 = vmatpush3.bf16.msra.mxu0 %v1790_v24  ;;  %1823 = vmatprep.subr.bf16.mxu1 %v1822_v39  ;;  %v1846_v2 = vpack.c.bf16 %v303_v62, %v302_v61  ;;  %v305_v4 = vld [vmem:[%s2356_s26 + $0x118] sm:$0xff]  ;;  %v1842_v5 = vpack.c.bf16 %v301_v1, %v300_v0  ;;  %v2424_v6 = vld [vmem:[#allocation9 + $0x8] sm:$0xff]  ;;  %v2426_v7 = vld [vmem:[#allocation9 + $0x10] sm:$0xff] }
  0x79   : > { %1795 = vmatprep.subr.bf16.mxu0 %v1794_v33  ;;  %v1850_v8 = vpack.c.bf16 %v305_v4, %v304_v3  ;;  %v306_v9 = vld [vmem:[%s2356_s26 + $0x120] sm:$0xff]  ;;  %v307_v10 = vld [vmem:[%s2356_s26 + $0x128] sm:$0xff]  ;;  %v2432_v11 = vld [vmem:[#allocation9 + $0x18] sm:$0xff] }
  0x7a   : > { %v2434_v12 = vld [vmem:[#allocation9 + $0x20] sm:$0xff]  ;;  %v1854_v13 = vpack.c.bf16 %v307_v10, %v306_v9  ;;  %v308_v14 = vld [vmem:[%s2356_s26 + $0x130] sm:$0xff]  ;;  %v309_v15 = vld [vmem:[%s2356_s26 + $0x138] sm:$0xff] }
  0x7b   : > { %1825 = vmatpush3.bf16.msra.mxu1 %v1822_v39  ;;  %v2440_v16 = vld [vmem:[#allocation9 + $0x28] sm:$0xff]  ;;  %v2442_v17 = vld [vmem:[#allocation9 + $0x30] sm:$0xff]  ;;  %v1858_v18 = vpack.c.bf16 %v309_v15, %v308_v14  ;;  %v310_v19 = vld [vmem:[%s2356_s26 + $0x140] sm:$0xff] }
  0x7c   : > { %1797 = vmatpush3.bf16.msra.mxu0 %v1794_v33  ;;  %1827 = vmatprep.subr.bf16.mxu1 %v1826_v45  ;;  %v311_v20 = vld [vmem:[%s2356_s26 + $0x148] sm:$0xff]  ;;  %v2450_v21 = vld [vmem:[#allocation9 + $0x38] sm:$0xff]  ;;  %v2452_v22 = vld [vmem:[#allocation9 + $0x40] sm:$0xff] }
  0x7d   : > { %1799 = vmatprep.subr.bf16.mxu0 %v1798_v42  ;;  %2774 = vst [vmem:[#allocation18_spill] sm:$0xff] %v2452_v22  ;;  %v1862_v23 = vpack.c.bf16 %v311_v20, %v310_v19  ;;  %v312_v24 = vld [vmem:[%s2356_s26 + $0x150] sm:$0xff]  ;;  %v313_v25 = vld [vmem:[%s2356_s26 + $0x158] sm:$0xff]  ;;  %v2460_v27 = vld [vmem:[#allocation9 + $0x48] sm:$0xff] }
  0x7e   : > { %2775 = vst [vmem:[#allocation19_spill] sm:$0xff] %v2460_v27  ;;  %v2462_v28 = vld [vmem:[#allocation9 + $0x50] sm:$0xff]  ;;  %v1866_v29 = vpack.c.bf16 %v313_v25, %v312_v24  ;;  %v314_v30 = vld [vmem:[%s2356_s26 + $0x160] sm:$0xff]  ;;  %v315_v31 = vld [vmem:[%s2356_s26 + $0x168] sm:$0xff] }
  0x7f   : > { %1829 = vmatpush3.bf16.msra.mxu1 %v1826_v45  ;;  %2776 = vst [vmem:[#allocation20_spill] sm:$0xff] %v2462_v28  ;;  %v2470_v32 = vld [vmem:[#allocation9 + $0x58] sm:$0xff]  ;;  %v2472_v33 = vld [vmem:[#allocation9 + $0x60] sm:$0xff]  ;;  %v1870_v34 = vpack.c.bf16 %v315_v31, %v314_v30  ;;  %v316_v35 = vld [vmem:[%s2356_s26 + $0x170] sm:$0xff] }
  0x80   : > { %1801 = vmatpush3.bf16.msra.mxu0 %v1798_v42  ;;  %1831 = vmatprep.subr.bf16.mxu1 %v1830_v51  ;;  %2777 = vst [vmem:[#allocation21_spill] sm:$0xff] %v2470_v32  ;;  %2778 = vst [vmem:[#allocation22_spill] sm:$0xff] %v2472_v33  ;;  %v317_v36 = vld [vmem:[%s2356_s26 + $0x178] sm:$0xff]  ;;  %v2480_v37 = vld [vmem:[#allocation9 + $0x68] sm:$0xff] }
  0x81   : > { %1803 = vmatprep.subr.bf16.mxu0 %v1802_v48  ;;  %2779 = vst [vmem:[#allocation23_spill] sm:$0xff] %v2480_v37  ;;  %v2482_v38 = vld [vmem:[#allocation9 + $0x70] sm:$0xff]  ;;  %v1874_v39 = vpack.c.bf16 %v317_v36, %v316_v35  ;;  %v2488_v40 = vld [vmem:[#allocation9 + $0x78] sm:$0xff] }
  0x82   : > { %2780 = vst [vmem:[#allocation24_spill] sm:$0xff] %v2482_v38  ;;  %2781 = vst [vmem:[#allocation25_spill] sm:$0xff] %v2488_v40 }
  0x83   : > { %1833 = vmatpush3.bf16.msra.mxu1 %v1830_v51 }
  0x84   : > { %1805 = vmatpush3.bf16.msra.mxu0 %v1802_v48  ;;  %1835 = vmatprep.subr.bf16.mxu1 %v1834_v57 }
  0x85   : > { %1807 = vmatprep.subr.bf16.mxu0 %v1806_v54 }
  0x87   : > { %1837 = vmatpush3.bf16.msra.mxu1 %v1834_v57 }
  0x88   : > { %1809 = vmatpush3.bf16.msra.mxu0 %v1806_v54  ;;  %1839 = vmatprep.subr.bf16.mxu1 %v1838_v63 }
  0x89   : > { %1811 = vmatprep.subr.bf16.mxu0 %v1810_v60 }
  0x8b   : > { %1841 = vmatpush3.bf16.msra.mxu1 %v1838_v63 }
  0x8c   : > { %1813 = vmatpush3.bf16.msra.mxu0 %v1810_v60  ;;  %1843 = vmatprep.subr.bf16.mxu1 %v1842_v5 }
  0x8d   : > { %1847 = vmatprep.subr.bf16.mxu0 %v1846_v2 }
  0x8f   : > { %1591 = vmatmul.mubr.f32.vlgmr.msra.gmra.mrb[0].mxu0 %v2424_v6  ;;  %1845 = vmatpush3.bf16.msra.mxu1 %v1842_v5 }
  0x90   : > { %1849 = vmatpush3.bf16.msra.mxu0 %v1846_v2  ;;  %1593 = vmatprep.mubr.f32.mxu0 %v2426_v7 }
  0x91   : > { %1851 = vmatprep.subr.bf16.mxu0 %v1850_v8 }
  0x92   : > { %1647 = vmatmul.mubr.f32.vlgmr.msra.gmra.mrb[0].mxu1 %v2424_v6 }
  0x93   : > { %1594 = vmatmul.mubr.f32.gmra.mrb[2].mxu0 %v2432_v11  ;;  %1649 = vmatprep.mubr.f32.mxu1 %v2426_v7 }
  0x94   : > { %1853 = vmatpush3.bf16.msra.mxu0 %v1850_v8  ;;  %1596 = vmatprep.mubr.f32.mxu0 %v2434_v12 }
  0x95   : > { %1855 = vmatprep.subr.bf16.mxu0 %v1854_v13 }
  0x96   : > { %1650 = vmatmul.mubr.f32.gmra.mrb[2].mxu1 %v2432_v11 }
  0x97   : > { %1597 = vmatmul.mubr.f32.gmra.mrb[4].mxu0 %v2440_v16  ;;  %1652 = vmatprep.mubr.f32.mxu1 %v2434_v12 }
  0x98   : > { %1857 = vmatpush3.bf16.msra.mxu0 %v1854_v13  ;;  %1599 = vmatprep.mubr.f32.mxu0 %v2442_v17 }
  0x99   : > { %1859 = vmatprep.subr.bf16.mxu0 %v1858_v18 }
  0x9a   : > { %1653 = vmatmul.mubr.f32.gmra.mrb[4].mxu1 %v2440_v16 }
  0x9b   : > { %1600 = vmatmul.mubr.f32.gmra.mrb[6].mxu0 %v2450_v21  ;;  %1655 = vmatprep.mubr.f32.mxu1 %v2442_v17 }
  0x9c   : > { %1861 = vmatpush3.bf16.msra.mxu0 %v1858_v18  ;;  %1602 = vmatprep.mubr.f32.mxu0 %v2452_v22 }
  0x9d   : > { %1863 = vmatprep.subr.bf16.mxu0 %v1862_v23 }
  0x9e   : > { %1656 = vmatmul.mubr.f32.gmra.mrb[6].mxu1 %v2450_v21 }
  0x9f   : > { %1603 = vmatmul.mubr.f32.gmra.mrb[8].mxu0 %v2460_v27  ;;  %1658 = vmatprep.mubr.f32.mxu1 %v2452_v22 }
  0xa0   : > { %1865 = vmatpush3.bf16.msra.mxu0 %v1862_v23  ;;  %1605 = vmatprep.mubr.f32.mxu0 %v2462_v28 }
  0xa1   : > { %1867 = vmatprep.subr.bf16.mxu0 %v1866_v29 }
  0xa2   : > { %1659 = vmatmul.mubr.f32.gmra.mrb[8].mxu1 %v2460_v27 }
  0xa3   : > { %1606 = vmatmul.mubr.f32.gmra.mrb[10].mxu0 %v2470_v32  ;;  %1661 = vmatprep.mubr.f32.mxu1 %v2462_v28 }
  0xa4   : > { %1869 = vmatpush3.bf16.msra.mxu0 %v1866_v29  ;;  %1608 = vmatprep.mubr.f32.mxu0 %v2472_v33 }
  0xa5   : > { %1871 = vmatprep.subr.bf16.mxu0 %v1870_v34 }
  0xa6   : > { %1662 = vmatmul.mubr.f32.gmra.mrb[10].mxu1 %v2470_v32 }
  0xa7   : > { %1609 = vmatmul.mubr.f32.gmra.mrb[12].mxu0 %v2480_v37  ;;  %1664 = vmatprep.mubr.f32.mxu1 %v2472_v33 }
  0xa8   : > { %1873 = vmatpush3.bf16.msra.mxu0 %v1870_v34  ;;  %1611 = vmatprep.mubr.f32.mxu0 %v2482_v38 }
  0xa9   : > { %1875 = vmatprep.subr.bf16.mxu0 %v1874_v39 }
  0xaa   : > { %1665 = vmatmul.mubr.f32.gmra.mrb[12].mxu1 %v2480_v37 }
  0xab   : > { %1612 = vmatmul.mubr.f32.gmra.mrb[14].mxu0 %v2488_v40  ;;  %1667 = vmatprep.mubr.f32.mxu1 %v2482_v38 }
  0xac   : > { %1877 = vmatpush3.bf16.msra.mxu0 %v1874_v39  ;;  %1702 = vmatprep.mubr.f32.mxu0 %v2391_v26 }
  0xae   : > { %1668 = vmatmul.mubr.f32.gmra.mrb[14].mxu1 %v2488_v40 }
  0xaf   : > { %1703 = vmatmul.mubr.f32.vlgmr.msra.gmra.mrb[16].mxu0 %v2424_v6 }
  0xb0   : > { %1705 = vmatprep.mubr.f32.mxu0 %v2426_v7 }
  0xb3   : > { %1706 = vmatmul.mubr.f32.gmra.mrb[18].mxu0 %v2432_v11 }
  0xb4   : > { %1708 = vmatprep.mubr.f32.mxu0 %v2434_v12 }
  0xb7   : > { %1709 = vmatmul.mubr.f32.gmra.mrb[20].mxu0 %v2440_v16 }
  0xb8   : > { %1711 = vmatprep.mubr.f32.mxu0 %v2442_v17 }
  0xbb   : > { %1712 = vmatmul.mubr.f32.gmra.mrb[22].mxu0 %v2450_v21 }
  0xbc   : > { %1714 = vmatprep.mubr.f32.mxu0 %v2452_v22 }
  0xbf   : > { %1715 = vmatmul.mubr.f32.gmra.mrb[24].mxu0 %v2460_v27 }
  0xc0   : > { %1717 = vmatprep.mubr.f32.mxu0 %v2462_v28 }
  0xc3   : > { %1718 = vmatmul.mubr.f32.gmra.mrb[26].mxu0 %v2470_v32 }
  0xc4   : > { %1720 = vmatprep.mubr.f32.mxu0 %v2472_v33 }
  0xc7   : > { %1721 = vmatmul.mubr.f32.gmra.mrb[28].mxu0 %v2480_v37 }
  0xc8   : > { %1723 = vmatprep.mubr.f32.mxu0 %v2482_v38 }
  0xcb   : > { %1724 = vmatmul.mubr.f32.gmra.mrb[30].mxu0 %v2488_v40 }
 0x162   : > { %v1592_v41 = vpop.f32.mrb[0].mxu0 }
 0x163   : > { %v384_v42 = vpop.f32.mrb[1].mxu0 }
 0x164   : > { %v1880_v38 = vpack.c.bf16 %v1592_v41, %v384_v42 }
 0x165   : > { %v1648_v45 = vpop.f32.mrb[0].mxu1 }
 0x166   : > { %v1595_v43 = vpop.f32.mrb[2].mxu0  ;;  %v529_v46 = vpop.f32.mrb[1].mxu1 }
 0x167   : > { %v394_v44 = vpop.f32.mrb[3].mxu0  ;;  %v1878_v40 = vpack.c.bf16 %v1648_v45, %v529_v46 }
 0x169   : > { %v1651_v49 = vpop.f32.mrb[2].mxu1 }
 0x16a   : > { %v2512_v47 = vpop.f32.mrb[4].mxu0  ;;  %v539_v50 = vpop.f32.mrb[3].mxu1 }
 0x16b   : > { %v2514_v48 = vpop.f32.mrb[5].mxu0  ;;  %v1882_v37 = vpack.c.bf16 %v1651_v49, %v539_v50 }
 0x16d   : > { %v1654_v53 = vpop.f32.mrb[4].mxu1 }
 0x16e   : > { %v2516_v51 = vpop.f32.mrb[6].mxu0  ;;  %v549_v54 = vpop.f32.mrb[5].mxu1 }
 0x16f   : > { %v2518_v52 = vpop.f32.mrb[7].mxu0 }
 0x171   : > { %v1657_v57 = vpop.f32.mrb[6].mxu1 }
 0x172   : > { %v2520_v55 = vpop.f32.mrb[8].mxu0  ;;  %v559_v58 = vpop.f32.mrb[7].mxu1 }
 0x173   : > { %v2522_v56 = vpop.f32.mrb[9].mxu0 }
 0x175   : > { %v2528_v61 = vpop.f32.mrb[8].mxu1 }
 0x176   : > { %v2524_v59 = vpop.f32.mrb[10].mxu0  ;;  %v2530_v62 = vpop.f32.mrb[9].mxu1 }
 0x177   : > { %v2526_v60 = vpop.f32.mrb[11].mxu0 }
 0x179   : > { %v2536_v1 = vpop.f32.mrb[10].mxu1 }
 0x17a   : > { %v2532_v63 = vpop.f32.mrb[12].mxu0  ;;  %v2538_v2 = vpop.f32.mrb[11].mxu1 }
 0x17b   : > { %v2534_v0 = vpop.f32.mrb[13].mxu0 }
 0x17d   : > { %v2544_v5 = vpop.f32.mrb[12].mxu1 }
 0x17e   : > { %v2540_v3 = vpop.f32.mrb[14].mxu0  ;;  %v2546_v8 = vpop.f32.mrb[13].mxu1 }
 0x17f   : > { %v2542_v4 = vpop.f32.mrb[15].mxu0 }
 0x181   : > { %v2548_v13 = vpop.f32.mrb[14].mxu1 }
 0x182   : > { %v1704_v9 = vpop.f32.mrb[16].mxu0  ;;  %v2550_v14 = vpop.f32.mrb[15].mxu1 }
 0x183   : > { %v674_v10 = vpop.f32.mrb[17].mxu0 }
 0x184   : > { %v1910_v33 = vpack.c.bf16 %v1704_v9, %v674_v10 }
 0x186   : > { %v1707_v15 = vpop.f32.mrb[18].mxu0 }
 0x187   : > { %v684_v18 = vpop.f32.mrb[19].mxu0 }
 0x18a   : > { %v1710_v19 = vpop.f32.mrb[20].mxu0 }
 0x18b   : > { %v694_v20 = vpop.f32.mrb[21].mxu0 }
 0x18e   : > { %v1713_v23 = vpop.f32.mrb[22].mxu0 }
 0x18f   : > { %v704_v24 = vpop.f32.mrb[23].mxu0 }
 0x192   : > { %v1716_v25 = vpop.f32.mrb[24].mxu0 }
 0x193   : > { %v714_v29 = vpop.f32.mrb[25].mxu0 }
 0x196   : > { %v1719_v30 = vpop.f32.mrb[26].mxu0 }
 0x197   : > { %v724_v31 = vpop.f32.mrb[27].mxu0 }
 0x19a   : > { %v1722_v34 = vpop.f32.mrb[28].mxu0 }
 0x19b   : > { %v734_v35 = vpop.f32.mrb[29].mxu0 }
 0x19e   : > { %v1725_v36 = vpop.f32.mrb[30].mxu0 }
 0x19f   : > { %v744_v39 = vpop.f32.mrb[31].mxu0 }
 0x1a0   : > { %2173 = dma.done.wait (%p2782_p11), [#allocation3], 6144  ;;  %p2783_p13 = pmov %p2782_p11 }
 0x1a1   : > { %v1914_v32 = vpack.c.bf16 %v1707_v15, %v684_v18  ;;  %1879 = vmatprep.subr.bf16.mxu1 %v1878_v40  ;;  %1911 = vmatprep.subr.bf16.mxu0 %v1910_v33  ;;  %v1884_v28 = vpack.c.bf16 %v1595_v43, %v394_v44  ;;  %v1886_v27 = vpack.c.bf16 %v1654_v53, %v549_v54  ;;  %v761_v42 = vld [vmem:[#allocation2 + $0x8] sm:$0xff]  ;;  %v762_v49 = vld [vmem:[#allocation2 + $0x10] sm:$0xff]  ;;  %v764_v53 = vld [vmem:[#allocation2 + $0x20] sm:$0xff]  ;;  %s2201_s29 = smov [#allocation9]   ;;  %p1969_p3 = scmp.eq.s32.totalorder %s2248_s19, 2 }
 0x1a2   : > { %2175 = vsyncadd (%p2783_p13), [#allocation3], 4294961152  ;;  %1881 = vmatpush3.bf16.msra.mxu1 %v1880_v38  ;;  %1913 = vmatpush3.bf16.msra.mxu0 %v1910_v33  ;;  %v1918_v22 = vpack.c.bf16 %v1710_v19, %v694_v20  ;;  %v1888_v41 = vpack.c.bf16 %v2512_v47, %v2514_v48  ;;  %v1890_v45 = vpack.c.bf16 %v1657_v57, %v559_v58  ;;  %v768_v54 = vld [vmem:[#allocation2 + $0x40] sm:$0xff]  ;;  %v767_v57 = vld [vmem:[#allocation2 + $0x38] sm:$0xff]  ;;  %s1255_s30 = sshll.u32 %s2201_s29, 4  ;;  %s1256_s30 = int_to_ptr.vmem [resolvable:$true] %s1255_s30 }
 0x1a3   : > { %1883 = vmatprep.subr.bf16.mxu1 %v1882_v37  ;;  %1915 = vmatprep.subr.bf16.mxu0 %v1914_v32  ;;  %v1922_v46 = vpack.c.bf16 %v1713_v23, %v704_v24  ;;  %v1892_v33 = vpack.c.bf16 %v2516_v51, %v2518_v52  ;;  %v1926_v37 = vpack.c.bf16 %v1716_v25, %v714_v29  ;;  %v760_v51 = vld [vmem:[#allocation2] sm:$0xff]  ;;  %v765_v52 = vld [vmem:[#allocation2 + $0x28] sm:$0xff]  ;;  %v774_v58 = vld [vmem:[#allocation2 + $0x70] sm:$0xff]  ;;  %s2122_s26 = scalar_lea.vmem %s1256_s30, 2048  ;;  %p2129_p4 = scmp.lt.s32.totalorder %s1256_s30, %s1256_s30 }
 0x1a4   : > { %879 = vmatprep.mubr.f32.mxu1 %v761_v42  ;;  %1758 = vmatprep.mubr.f32.mxu0 %v762_v49  ;;  %v1930_v38 = vpack.c.bf16 %v1719_v30, %v724_v31  ;;  %v1902_v40 = vpack.c.bf16 %v2544_v5, %v2546_v8  ;;  %v1934_v43 = vpack.c.bf16 %v1722_v34, %v734_v35  ;;  %v776_v5 = vld [vmem:[#allocation2 + $0x80] sm:$0xff]  ;;  %v775_v9 = vld [vmem:[#allocation2 + $0x78] sm:$0xff]  ;;  %v778_v15 = vld [vmem:[#allocation2 + $0x90] sm:$0xff]  ;;  %p2123_p7 = scmp.ne.s32.totalorder %s1256_s30, %s2122_s26  ;;  %p2130_p5 = scmp.lt.s32.totalorder %s2122_s26, %s2122_s26 }
 0x1a5   : > { %v1904_v44 = vpack.c.bf16 %v2532_v63, %v2534_v0  ;;  %v1906_v47 = vpack.c.bf16 %v2548_v13, %v2550_v14  ;;  %v1938_v48 = vpack.c.bf16 %v1725_v36, %v744_v39  ;;  %v1908_v50 = vpack.c.bf16 %v2540_v3, %v2542_v4  ;;  %v769_v63 = vld [vmem:[#allocation2 + $0x48] sm:$0xff]  ;;  %v783_v0 = vld [vmem:[#allocation2 + $0xb8] sm:$0xff]  ;;  %v772_v3 = vld [vmem:[#allocation2 + $0x60] sm:$0xff] }
 0x1a6   : > { %1885 = vmatpush3.bf16.msra.mxu1 %v1884_v28  ;;  %1917 = vmatpush3.bf16.msra.mxu0 %v1914_v32  ;;  %v1894_v28 = vpack.c.bf16 %v2528_v61, %v2530_v62  ;;  %v1898_v32 = vpack.c.bf16 %v2536_v1, %v2538_v2  ;;  %v770_v61 = vld [vmem:[#allocation2 + $0x50] sm:$0xff]  ;;  %v780_v62 = vld [vmem:[#allocation2 + $0xa0] sm:$0xff]  ;;  %v773_v1 = vld [vmem:[#allocation2 + $0x68] sm:$0xff]  ;;  %p2124_p10 = pnand %p2123_p7, %p1969_p3  ;;  %p2131_p6 = por %p2130_p5, %p2129_p4 }
 0x1a7   : > { %1887 = vmatprep.subr.bf16.mxu1 %v1886_v27  ;;  %1919 = vmatprep.subr.bf16.mxu0 %v1918_v22  ;;  %v1896_v27 = vpack.c.bf16 %v2520_v55, %v2522_v56  ;;  %v763_v55 = vld [vmem:[#allocation2 + $0x18] sm:$0xff]  ;;  %v786_v2 = vld [vmem:[#allocation2 + $0xd0] sm:$0xff]  ;;  %v789_v4 = vld [vmem:[#allocation2 + $0xe8] sm:$0xff] }
 0x1a8   : > { %v771_v56 = vld [vmem:[#allocation2 + $0x58] sm:$0xff]  ;;  %v792_v8 = vld [vmem:[#allocation2 + $0x100] sm:$0xff]  ;;  %v798_v14 = vld [vmem:[#allocation2 + $0x130] sm:$0xff]  ;;  %p2125_p1 = pneg %p2124_p10 }
 0x1a9   : > { %v795_v10 = vld [vmem:[#allocation2 + $0x118] sm:$0xff]  ;;  %v801_v18 = vld [vmem:[#allocation2 + $0x148] sm:$0xff]  ;;  %v782_v19 = vld [vmem:[#allocation2 + $0xb0] sm:$0xff] }
 0x1aa   : > { %1889 = vmatpush3.bf16.msra.mxu1 %v1888_v41  ;;  %1921 = vmatpush3.bf16.msra.mxu0 %v1918_v22  ;;  %v1900_v22 = vpack.c.bf16 %v2524_v59, %v2526_v60  ;;  %v766_v59 = vld [vmem:[#allocation2 + $0x30] sm:$0xff]  ;;  %v777_v60 = vld [vmem:[#allocation2 + $0x88] sm:$0xff]  ;;  %v779_v13 = vld [vmem:[#allocation2 + $0x98] sm:$0xff]  ;;  %p2132_p9 = pnand %p2131_p6, %p2125_p1 }
 0x1ab   : > { %1891 = vmatprep.subr.bf16.mxu1 %v1890_v45  ;;  %1923 = vmatprep.subr.bf16.mxu0 %v1922_v46  ;;  %v804_v20 = vld [vmem:[#allocation2 + $0x160] sm:$0xff]  ;;  %v781_v23 = vld [vmem:[#allocation2 + $0xa8] sm:$0xff]  ;;  %v807_v24 = vld [vmem:[#allocation2 + $0x178] sm:$0xff] }
 0x1ac   : > { %v785_v25 = vld [vmem:[#allocation2 + $0xc8] sm:$0xff]  ;;  %v784_v29 = vld [vmem:[#allocation2 + $0xc0] sm:$0xff]  ;;  %v787_v31 = vld [vmem:[#allocation2 + $0xd8] sm:$0xff] }
 0x1ad   : > { %v788_v30 = vld [vmem:[#allocation2 + $0xe0] sm:$0xff]  ;;  %v791_v34 = vld [vmem:[#allocation2 + $0xf8] sm:$0xff]  ;;  %v790_v35 = vld [vmem:[#allocation2 + $0xf0] sm:$0xff] }
 0x1ae   : > { %1893 = vmatpush3.bf16.msra.mxu1 %v1892_v33  ;;  %1925 = vmatpush3.bf16.msra.mxu0 %v1922_v46  ;;  %v794_v36 = vld [vmem:[#allocation2 + $0x110] sm:$0xff]  ;;  %v793_v39 = vld [vmem:[#allocation2 + $0x108] sm:$0xff]  ;;  %v796_v42 = vld [vmem:[#allocation2 + $0x120] sm:$0xff] }
 0x1af   : > { %1895 = vmatprep.subr.bf16.mxu1 %v1894_v28  ;;  %1927 = vmatprep.subr.bf16.mxu0 %v1926_v37  ;;  %v797_v41 = vld [vmem:[#allocation2 + $0x128] sm:$0xff]  ;;  %v800_v45 = vld [vmem:[#allocation2 + $0x140] sm:$0xff]  ;;  %v799_v46 = vld [vmem:[#allocation2 + $0x138] sm:$0xff] }
 0x1b0   : > { %v803_v49 = vld [vmem:[#allocation2 + $0x158] sm:$0xff]  ;;  %v802_v33 = vld [vmem:[#allocation2 + $0x150] sm:$0xff] }
 0x1b1   : > { %v806_v28 = vld [vmem:[#allocation2 + $0x170] sm:$0xff] }
 0x1b2   : > { %1897 = vmatpush3.bf16.msra.mxu1 %v1896_v27  ;;  %1929 = vmatpush3.bf16.msra.mxu0 %v1926_v37  ;;  %v805_v37 = vld [vmem:[#allocation2 + $0x168] sm:$0xff] }
 0x1b3   : > { %1899 = vmatprep.subr.bf16.mxu1 %v1898_v32  ;;  %1931 = vmatprep.subr.bf16.mxu0 %v1930_v38 }
 0x1b6   : > { %1901 = vmatpush3.bf16.msra.mxu1 %v1900_v22  ;;  %1933 = vmatpush3.bf16.msra.mxu0 %v1930_v38  ;;  %v2581_v22 = vld [vmem:[%s206_s23] ss:$0 sm:$0xff] }
 0x1b7   : > { %1903 = vmatprep.subr.bf16.mxu1 %v1902_v40  ;;  %1935 = vmatprep.subr.bf16.mxu0 %v1934_v43 }
 0x1ba   : > { %1905 = vmatpush3.bf16.msra.mxu1 %v1904_v44  ;;  %1937 = vmatpush3.bf16.msra.mxu0 %v1934_v43 }
 0x1bb   : > { %1907 = vmatprep.subr.bf16.mxu1 %v1906_v47  ;;  %1939 = vmatprep.subr.bf16.mxu0 %v1938_v48 }
 0x1be   : > { %1909 = vmatpush3.bf16.msra.mxu1 %v1908_v50  ;;  %1941 = vmatpush3.bf16.msra.mxu0 %v1938_v48 }
 0x1c1   : > { %880 = vmatmul.mubr.f32.vlgmr.msra.gmra.mrb[16].mxu1 %v760_v51  ;;  %1759 = vmatmul.mubr.f32.vlgmr.msra.gmra.mrb[32].mxu0 %v765_v52 }
 0x1c2   : > { %884 = vmatprep.mubr.f32.mxu1 %v764_v53  ;;  %1761 = vmatprep.mubr.f32.mxu0 %v768_v54 }
 0x1c5   : > { %885 = vmatmul.mubr.f32.gmra.mrb[18].mxu1 %v763_v55  ;;  %1762 = vmatmul.mubr.f32.gmra.mrb[34].mxu0 %v771_v56 }
 0x1c6   : > { %889 = vmatprep.mubr.f32.mxu1 %v767_v57  ;;  %1764 = vmatprep.mubr.f32.mxu0 %v774_v58 }
 0x1c9   : > { %890 = vmatmul.mubr.f32.gmra.mrb[20].mxu1 %v766_v59  ;;  %1765 = vmatmul.mubr.f32.gmra.mrb[36].mxu0 %v777_v60 }
 0x1ca   : > { %894 = vmatprep.mubr.f32.mxu1 %v770_v61  ;;  %1767 = vmatprep.mubr.f32.mxu0 %v780_v62 }
 0x1cd   : > { %895 = vmatmul.mubr.f32.gmra.mrb[22].mxu1 %v769_v63  ;;  %1768 = vmatmul.mubr.f32.gmra.mrb[38].mxu0 %v783_v0 }
 0x1ce   : > { %899 = vmatprep.mubr.f32.mxu1 %v773_v1  ;;  %1770 = vmatprep.mubr.f32.mxu0 %v786_v2 }
 0x1d1   : > { %900 = vmatmul.mubr.f32.gmra.mrb[24].mxu1 %v772_v3  ;;  %1771 = vmatmul.mubr.f32.gmra.mrb[40].mxu0 %v789_v4 }
 0x1d2   : > { %904 = vmatprep.mubr.f32.mxu1 %v776_v5  ;;  %1773 = vmatprep.mubr.f32.mxu0 %v792_v8 }
 0x1d5   : > { %905 = vmatmul.mubr.f32.gmra.mrb[26].mxu1 %v775_v9  ;;  %1774 = vmatmul.mubr.f32.gmra.mrb[42].mxu0 %v795_v10 }
 0x1d6   : > { %909 = vmatprep.mubr.f32.mxu1 %v779_v13  ;;  %1776 = vmatprep.mubr.f32.mxu0 %v798_v14 }
 0x1d9   : > { %910 = vmatmul.mubr.f32.gmra.mrb[28].mxu1 %v778_v15  ;;  %1777 = vmatmul.mubr.f32.gmra.mrb[44].mxu0 %v801_v18 }
 0x1da   : > { %914 = vmatprep.mubr.f32.mxu1 %v782_v19  ;;  %1779 = vmatprep.mubr.f32.mxu0 %v804_v20 }
 0x1dd   : > { %915 = vmatmul.mubr.f32.gmra.mrb[30].mxu1 %v781_v23  ;;  %1780 = vmatmul.mubr.f32.gmra.mrb[46].mxu0 %v807_v24 }
 0x1de   : > { %919 = vmatprep.mubr.f32.mxu1 %v785_v25 }
 0x1e1   : > { %920 = vmatmul.mubr.f32.gmra.mrb[32].mxu1 %v784_v29 }
 0x1e2   : > { %924 = vmatprep.mubr.f32.mxu1 %v788_v30 }
 0x1e5   : > { %925 = vmatmul.mubr.f32.gmra.mrb[34].mxu1 %v787_v31 }
 0x1e6   : > { %929 = vmatprep.mubr.f32.mxu1 %v791_v34 }
 0x1e9   : > { %930 = vmatmul.mubr.f32.gmra.mrb[36].mxu1 %v790_v35 }
 0x1ea   : > { %934 = vmatprep.mubr.f32.mxu1 %v794_v36 }
 0x1ed   : > { %935 = vmatmul.mubr.f32.gmra.mrb[38].mxu1 %v793_v39 }
 0x1ee   : > { %939 = vmatprep.mubr.f32.mxu1 %v797_v41 }
 0x1f1   : > { %940 = vmatmul.mubr.f32.gmra.mrb[40].mxu1 %v796_v42 }
 0x1f2   : > { %944 = vmatprep.mubr.f32.mxu1 %v800_v45 }
 0x1f5   : > { %945 = vmatmul.mubr.f32.gmra.mrb[42].mxu1 %v799_v46 }
 0x1f6   : > { %949 = vmatprep.mubr.f32.mxu1 %v803_v49 }
 0x1f9   : > { %950 = vmatmul.mubr.f32.gmra.mrb[44].mxu1 %v802_v33 }
 0x1fa   : > { %954 = vmatprep.mubr.f32.mxu1 %v806_v28 }
 0x1fd   : > { %955 = vmatmul.mubr.f32.gmra.mrb[46].mxu1 %v805_v37 }
 0x294   : > { %v1478_v27 = vpop.f32.mrb[16].mxu1  ;;  %v1760_v32 = vpop.f32.mrb[32].mxu0 }
 0x295   : > { %v1479_v38 = vpop.f32.mrb[17].mxu1  ;;  %v1026_v40 = vpop.f32.mrb[33].mxu0 }
 0x296   : > { %v1480_v43 = vadd.f32 %v1479_v38, %v1478_v27 }
 0x298   : > { %v1481_v44 = vpop.f32.mrb[18].mxu1  ;;  %v882_v47 = vadd.f32 %v1480_v43, %v2581_v22  ;;  %v1763_v48 = vpop.f32.mrb[34].mxu0 }
 0x299   : > { %v1482_v50 = vpop.f32.mrb[19].mxu1  ;;  %v1036_v51 = vpop.f32.mrb[35].mxu0 }
 0x29a   : > { %v1483_v52 = vadd.f32 %v1482_v50, %v1481_v44  ;;  %v1027_v53 = vadd.f32 %v1026_v40, %v882_v47 }
 0x29c   : > { %v887_v54 = vadd.f32 %v1483_v52, %v2581_v22  ;;  %v1105_v55 = vmax.f32 %v1027_v53, 0.0  ;;  %v1484_v56 = vpop.f32.mrb[20].mxu1  ;;  %v1766_v57 = vpop.f32.mrb[36].mxu0 }
 0x29d   : > { %v1485_v58 = vpop.f32.mrb[21].mxu1  ;;  %v1046_v59 = vpop.f32.mrb[37].mxu0 }
 0x29e   : > { %v2586_v60 = vadd.f32 %v1105_v55, %v2391_v26  ;;  %v1486_v61 = vadd.f32 %v1485_v58, %v1484_v56  ;;  %v1032_v62 = vadd.f32 %v1760_v32, %v887_v54 }
 0x2a0   : > { %v1487_v63 = vpop.f32.mrb[22].mxu1  ;;  %v892_v0 = vadd.f32 %v1486_v61, %v2581_v22  ;;  %v1137_v1 = vmul.f32 %v2586_v60, %v2586_v60  ;;  %v1106_v2 = vmax.f32 %v1032_v62, 0.0  ;;  %v1769_v3 = vpop.f32.mrb[38].mxu0 }
 0x2a1   : > { %v1488_v4 = vpop.f32.mrb[23].mxu1  ;;  %v1056_v5 = vpop.f32.mrb[39].mxu0 }
 0x2a2   : > { %v1489_v8 = vadd.f32 %v1488_v4, %v1487_v63  ;;  %v1037_v9 = vadd.f32 %v1036_v51, %v892_v0  ;;  %1153 = vadd.xlane.f32.xlu0 %v1137_v1  ;;  %v2592_v10 = vadd.f32 %v1106_v2, %v2424_v6 }
 0x2a4   : > { %v897_v26 = vadd.f32 %v1489_v8, %v2581_v22  ;;  %v1107_v13 = vmax.f32 %v1037_v9, 0.0  ;;  %v1490_v14 = vpop.f32.mrb[24].mxu1  ;;  %v1138_v15 = vmul.f32 %v2592_v10, %v2592_v10  ;;  %v2597_v18 = vpop.f32.mrb[40].mxu0 }
 0x2a5   : > { %v1491_v19 = vpop.f32.mrb[25].mxu1  ;;  %v1066_v20 = vpop.f32.mrb[41].mxu0 }
 0x2a6   : > { %v2600_v23 = vadd.f32 %v1107_v13, %v2426_v7  ;;  %v1492_v24 = vadd.f32 %v1491_v19, %v1490_v14  ;;  %1155 = vadd.xlane.f32.xlu0 %v1138_v15  ;;  %v1042_v25 = vadd.f32 %v1763_v48, %v897_v26  ;;  %v2784_v13 = vld [vmem:[#allocation18_spill] sm:$0xff] }
 0x2a8   : > { %v1493_v29 = vpop.f32.mrb[26].mxu1  ;;  %v902_v6 = vadd.f32 %v1492_v24, %v2581_v22  ;;  %v1139_v30 = vmul.f32 %v2600_v23, %v2600_v23  ;;  %v1108_v31 = vmax.f32 %v1042_v25, 0.0  ;;  %v2605_v34 = vpop.f32.mrb[42].mxu0 }
 0x2a9   : > { %v1494_v35 = vpop.f32.mrb[27].mxu1  ;;  %v1076_v36 = vpop.f32.mrb[43].mxu0 }
 0x2aa   : > { %v1495_v39 = vadd.f32 %v1494_v35, %v1493_v29  ;;  %v1047_v41 = vadd.f32 %v1046_v59, %v902_v6  ;;  %1157 = vadd.xlane.f32.xlu1 %v1139_v30  ;;  %v2608_v7 = vadd.f32 %v1108_v31, %v2432_v11  ;;  %v2785_v31 = vld [vmem:[#allocation19_spill] sm:$0xff] }
 0x2ac   : > { %v907_v42 = vadd.f32 %v1495_v39, %v2581_v22  ;;  %v1109_v45 = vmax.f32 %v1047_v41, 0.0  ;;  %v1496_v46 = vpop.f32.mrb[28].mxu1  ;;  %v1140_v49 = vmul.f32 %v2608_v7, %v2608_v7  ;;  %v2613_v33 = vpop.f32.mrb[44].mxu0 }
 0x2ad   : > { %v1497_v28 = vpop.f32.mrb[29].mxu1  ;;  %v2615_v37 = vpop.f32.mrb[45].mxu0 }
 0x2ae   : > { %v2618_v27 = vadd.f32 %v1109_v45, %v2434_v12  ;;  %v1498_v32 = vadd.f32 %v1497_v28, %v1496_v46  ;;  %1159 = vadd.xlane.f32.xlu1 %v1140_v49  ;;  %v1052_v38 = vadd.f32 %v1766_v57, %v907_v42  ;;  %v2786_v46 = vld [vmem:[#allocation20_spill] sm:$0xff] }
 0x2b0   : > { %v1499_v11 = vpop.f32.mrb[30].mxu1  ;;  %v912_v40 = vadd.f32 %v1498_v32, %v2581_v22  ;;  %v1141_v43 = vmul.f32 %v2618_v27, %v2618_v27  ;;  %v1110_v44 = vmax.f32 %v1052_v38, 0.0  ;;  %v2623_v47 = vpop.f32.mrb[46].mxu0 }
 0x2b1   : > { %v1500_v48 = vpop.f32.mrb[31].mxu1  ;;  %v2625_v50 = vpop.f32.mrb[47].mxu0 }
 0x2b2   : > { %v1501_v51 = vadd.f32 %v1500_v48, %v1499_v11  ;;  %v1057_v52 = vadd.f32 %v1056_v5, %v912_v40  ;;  %1161 = vadd.xlane.f32.xlu0 %v1141_v43  ;;  %v2628_v12 = vadd.f32 %v1110_v44, %v2440_v16 }
 0x2b4   : > { %v917_v53 = vadd.f32 %v1501_v51, %v2581_v22  ;;  %v1111_v54 = vmax.f32 %v1057_v52, 0.0  ;;  %v1502_v55 = vpop.f32.mrb[32].mxu1  ;;  %v1142_v56 = vmul.f32 %v2628_v12, %v2628_v12  ;;  %v2787_v51 = vld [vmem:[#allocation21_spill] sm:$0xff] }
 0x2b5   : > { %v1503_v57 = vpop.f32.mrb[33].mxu1 }
 0x2b6   : > { %v2634_v58 = vadd.f32 %v1111_v54, %v2442_v17  ;;  %v1504_v59 = vadd.f32 %v1503_v57, %v1502_v55  ;;  %1163 = vadd.xlane.f32.xlu1 %v1142_v56  ;;  %v1062_v61 = vadd.f32 %v1769_v3, %v917_v53  ;;  %v2788_v57 = vld [vmem:[#allocation22_spill] sm:$0xff] }
 0x2b8   : > { %v1505_v62 = vpop.f32.mrb[34].mxu1  ;;  %v922_v63 = vadd.f32 %v1504_v59, %v2581_v22  ;;  %v1143_v16 = vmul.f32 %v2634_v58, %v2634_v58  ;;  %v1112_v0 = vmax.f32 %v1062_v61, 0.0 }
 0x2b9   : > { %v1506_v1 = vpop.f32.mrb[35].mxu1 }
 0x2ba   : > { %v1507_v2 = vadd.f32 %v1506_v1, %v1505_v62  ;;  %v1067_v4 = vadd.f32 %v1066_v20, %v922_v63  ;;  %1165 = vadd.xlane.f32.xlu0 %v1143_v16  ;;  %v2640_v5 = vadd.f32 %v1112_v0, %v2450_v21 }
 0x2bc   : > { %v927_v17 = vadd.f32 %v1507_v2, %v2581_v22  ;;  %v1113_v8 = vmax.f32 %v1067_v4, 0.0  ;;  %v1508_v9 = vpop.f32.mrb[36].mxu1  ;;  %v1144_v3 = vmul.f32 %v2640_v5, %v2640_v5 }
 0x2bd   : > { %v1509_v26 = vpop.f32.mrb[37].mxu1 }
 0x2be   : > { %v2646_v14 = vadd.f32 %v1113_v8, %v2784_v13  ;;  %v1510_v15 = vadd.f32 %v1509_v26, %v1508_v9  ;;  %1167 = vadd.xlane.f32.xlu1 %v1144_v3  ;;  %v1072_v19 = vadd.f32 %v2597_v18, %v927_v17  ;;  %v2789_v17 = vld [vmem:[#allocation23_spill] sm:$0xff]  ;;  %v2790_v26 = vld [vmem:[#allocation24_spill] sm:$0xff] }
 0x2c0   : > { %v1511_v20 = vpop.f32.mrb[38].mxu1  ;;  %v932_v24 = vadd.f32 %v1510_v15, %v2581_v22  ;;  %v1145_v21 = vmul.f32 %v2646_v14, %v2646_v14  ;;  %v1114_v25 = vmax.f32 %v1072_v19, 0.0 }
 0x2c1   : > { %v1512_v29 = vpop.f32.mrb[39].mxu1 }
 0x2c2   : > { %v1513_v6 = vadd.f32 %v1512_v29, %v1511_v20  ;;  %v1077_v30 = vadd.f32 %v1076_v36, %v932_v24  ;;  %1169 = vadd.xlane.f32.xlu0 %v1145_v21  ;;  %v2653_v35 = vadd.f32 %v1114_v25, %v2785_v31  ;;  %v2791_v20 = vld [vmem:[#allocation25_spill] sm:$0xff] }
 0x2c4   : > { %v937_v39 = vadd.f32 %v1513_v6, %v2581_v22  ;;  %v1115_v41 = vmax.f32 %v1077_v30, 0.0  ;;  %v1514_v42 = vpop.f32.mrb[40].mxu1  ;;  %v1146_v18 = vmul.f32 %v2653_v35, %v2653_v35 }
 0x2c5   : > { %v1515_v45 = vpop.f32.mrb[41].mxu1 }
 0x2c6   : > { %v2659_v49 = vadd.f32 %v1115_v41, %v2786_v46  ;;  %v1516_v28 = vadd.f32 %v1515_v45, %v1514_v42  ;;  %1171 = vadd.xlane.f32.xlu1 %v1146_v18  ;;  %v1082_v32 = vadd.f32 %v2605_v34, %v937_v39 }
 0x2c8   : > { %v1517_v36 = vpop.f32.mrb[42].mxu1  ;;  %v942_v38 = vadd.f32 %v1516_v28, %v2581_v22  ;;  %v1147_v11 = vmul.f32 %v2659_v49, %v2659_v49  ;;  %v1116_v40 = vmax.f32 %v1082_v32, 0.0 }
 0x2c9   : > { %v1518_v43 = vpop.f32.mrb[43].mxu1 }
 0x2ca   : > { %v1519_v44 = vadd.f32 %v1518_v43, %v1517_v36  ;;  %v1087_v48 = vadd.f32 %v2615_v37, %v942_v38  ;;  %1173 = vadd.xlane.f32.xlu0 %v1147_v11  ;;  %v2667_v52 = vadd.f32 %v1116_v40, %v2787_v51 }
 0x2cc   : > { %v947_v53 = vadd.f32 %v1519_v44, %v2581_v22  ;;  %v1117_v54 = vmax.f32 %v1087_v48, 0.0  ;;  %v1520_v55 = vpop.f32.mrb[44].mxu1  ;;  %v1148_v34 = vmul.f32 %v2667_v52, %v2667_v52 }
 0x2cd   : > { %v1521_v56 = vpop.f32.mrb[45].mxu1 }
 0x2ce   : > { %v2673_v59 = vadd.f32 %v1117_v54, %v2788_v57  ;;  %v1522_v61 = vadd.f32 %v1521_v56, %v1520_v55  ;;  %1175 = vadd.xlane.f32.xlu1 %v1148_v34  ;;  %v1092_v62 = vadd.f32 %v2613_v33, %v947_v53 }
 0x2d0   : > { %v1523_v37 = vpop.f32.mrb[46].mxu1  ;;  %v952_v63 = vadd.f32 %v1522_v61, %v2581_v22  ;;  %v1149_v16 = vmul.f32 %v2673_v59, %v2673_v59  ;;  %v1118_v0 = vmax.f32 %v1092_v62, 0.0 }
 0x2d1   : > { %v1524_v1 = vpop.f32.mrb[47].mxu1 }
 0x2d2   : > { %v1525_v2 = vadd.f32 %v1524_v1, %v1523_v37  ;;  %v1097_v4 = vadd.f32 %v2625_v50, %v952_v63  ;;  %1177 = vadd.xlane.f32.xlu0 %v1149_v16  ;;  %v2681_v8 = vadd.f32 %v1118_v0, %v2789_v17 }
 0x2d4   : > { %v957_v9 = vadd.f32 %v1525_v2, %v2581_v22  ;;  %v1119_v3 = vmax.f32 %v1097_v4, 0.0  ;;  %v1150_v33 = vmul.f32 %v2681_v8, %v2681_v8 }
 0x2d6   : > { %v2687_v13 = vadd.f32 %v1119_v3, %v2790_v26  ;;  %1179 = vadd.xlane.f32.xlu1 %v1150_v33  ;;  %v1102_v15 = vadd.f32 %v2623_v47, %v957_v9 }
 0x2d8   : > { %v1151_v19 = vmul.f32 %v2687_v13, %v2687_v13  ;;  %v1120_v50 = vmax.f32 %v1102_v15, 0.0 }
 0x2da   : > { %1181 = vadd.xlane.f32.xlu0 %v1151_v19  ;;  %v2693_v24 = vadd.f32 %v1120_v50, %v2791_v20 }
 0x2dc   : > { %v1152_v22 = vmul.f32 %v2693_v24, %v2693_v24 }
 0x2de   : > { %1183 = vadd.xlane.f32.xlu1 %v1152_v22 }
 0x32f   : > { %v1154_v21 = vpop.xlane.xlu0 %1153 }
 0x330   : > { %v1185_v25 = vmax.f32 %v1154_v21, 1e-24 }
 0x332   : > { %2010 = vrsqrt.f32 %v1185_v25 }
 0x333   : > { %v1156_v29 = vpop.xlane.xlu0 %1155 }
 0x334   : > { %v1186_v6 = vmax.f32 %v1156_v29, 1e-24 }
 0x336   : > { %2012 = vrsqrt.f32 %v1186_v6 }
 0x337   : > { %v1158_v30 = vpop.xlane.xlu1 %1157 }
 0x338   : > { %v1187_v47 = vmax.f32 %v1158_v30, 1e-24 }
 0x33a   : > { %2014 = vrsqrt.f32 %v1187_v47 }
 0x33b   : > { %v1160_v31 = vpop.xlane.xlu1 %1159 }
 0x33c   : > { %v2011_v39 = vpop.eup %2010  ;;  %v1188_v41 = vmax.f32 %v1160_v31, 1e-24 }
 0x33d   : > { %v1217_v42 = vmul.f32 %v2011_v39, %v2586_v60 }
 0x33e   : > { %2016 = vrsqrt.f32 %v1188_v41 }
 0x33f   : > { %1233 = vst [vmem:[#allocation9] sm:$0xff] %v1217_v42  ;;  %v1162_v18 = vpop.xlane.xlu0 %1161 }
 0x340   : > { %v2013_v45 = vpop.eup %2012  ;;  %v1189_v46 = vmax.f32 %v1162_v18, 1e-24 }
 0x341   : > { %v1218_v28 = vmul.f32 %v2013_v45, %v2592_v10 }
 0x342   : > { %2018 = vrsqrt.f32 %v1189_v46 }
 0x343   : > { %1234 = vst [vmem:[#allocation9 + $0x8] sm:$0xff] %v1218_v28  ;;  %v1164_v32 = vpop.xlane.xlu1 %1163 }
 0x344   : > { %v2015_v36 = vpop.eup %2014  ;;  %v1190_v38 = vmax.f32 %v1164_v32, 1e-24 }
 0x345   : > { %v1219_v11 = vmul.f32 %v2015_v36, %v2600_v23 }
 0x346   : > { %2020 = vrsqrt.f32 %v1190_v38 }
 0x347   : > { %1235 = vst [vmem:[#allocation9 + $0x10] sm:$0xff] %v1219_v11  ;;  %v1166_v40 = vpop.xlane.xlu0 %1165 }
 0x348   : > { %v2017_v43 = vpop.eup %2016  ;;  %v1191_v44 = vmax.f32 %v1166_v40, 1e-24 }
 0x349   : > { %v1220_v60 = vmul.f32 %v2017_v43, %v2608_v7 }
 0x34a   : > { %2022 = vrsqrt.f32 %v1191_v44 }
 0x34b   : > { %1236 = vst [vmem:[#allocation9 + $0x18] sm:$0xff] %v1220_v60  ;;  %v1168_v48 = vpop.xlane.xlu1 %1167 }
 0x34c   : > { %v2019_v51 = vpop.eup %2018  ;;  %v1192_v53 = vmax.f32 %v1168_v48, 1e-24 }
 0x34d   : > { %v1221_v10 = vmul.f32 %v2019_v51, %v2618_v27 }
 0x34e   : > { %2024 = vrsqrt.f32 %v1192_v53 }
 0x34f   : > { %1237 = vst [vmem:[#allocation9 + $0x20] sm:$0xff] %v1221_v10  ;;  %v1170_v54 = vpop.xlane.xlu0 %1169 }
 0x350   : > { %v2021_v55 = vpop.eup %2020  ;;  %v1193_v34 = vmax.f32 %v1170_v54, 1e-24 }
 0x351   : > { %v1222_v23 = vmul.f32 %v2021_v55, %v2628_v12 }
 0x352   : > { %2026 = vrsqrt.f32 %v1193_v34 }
 0x353   : > { %1238 = vst [vmem:[#allocation9 + $0x28] sm:$0xff] %v1222_v23  ;;  %v1172_v56 = vpop.xlane.xlu1 %1171 }
 0x354   : > { %v2023_v57 = vpop.eup %2022  ;;  %v1194_v61 = vmax.f32 %v1172_v56, 1e-24 }
 0x355   : > { %v1223_v7 = vmul.f32 %v2023_v57, %v2634_v58 }
 0x356   : > { %2028 = vrsqrt.f32 %v1194_v61 }
 0x357   : > { %1239 = vst [vmem:[#allocation9 + $0x30] sm:$0xff] %v1223_v7  ;;  %v1174_v62 = vpop.xlane.xlu0 %1173 }
 0x358   : > { %v2025_v37 = vpop.eup %2024  ;;  %v1195_v63 = vmax.f32 %v1174_v62, 1e-24 }
 0x359   : > { %v1224_v27 = vmul.f32 %v2025_v37, %v2640_v5 }
 0x35a   : > { %2030 = vrsqrt.f32 %v1195_v63 }
 0x35b   : > { %1240 = vst [vmem:[#allocation9 + $0x38] sm:$0xff] %v1224_v27  ;;  %v1176_v16 = vpop.xlane.xlu1 %1175 }
 0x35c   : > { %v2027_v0 = vpop.eup %2026  ;;  %v1196_v1 = vmax.f32 %v1176_v16, 1e-24 }
 0x35d   : > { %v1225_v12 = vmul.f32 %v2027_v0, %v2646_v14 }
 0x35e   : > { %2032 = vrsqrt.f32 %v1196_v1 }
 0x35f   : > { %1241 = vst [vmem:[#allocation9 + $0x40] sm:$0xff] %v1225_v12  ;;  %v1178_v2 = vpop.xlane.xlu0 %1177 }
 0x360   : > { %v2029_v4 = vpop.eup %2028  ;;  %v1197_v17 = vmax.f32 %v1178_v2, 1e-24 }
 0x361   : > { %v1226_v58 = vmul.f32 %v2029_v4, %v2653_v35 }
 0x362   : > { %2034 = vrsqrt.f32 %v1197_v17 }
 0x363   : > { %1242 = vst [vmem:[#allocation9 + $0x48] sm:$0xff] %v1226_v58  ;;  %v1180_v9 = vpop.xlane.xlu1 %1179 }
 0x364   : > { %v2031_v3 = vpop.eup %2030  ;;  %v1198_v33 = vmax.f32 %v1180_v9, 1e-24 }
 0x365   : > { %v1227_v5 = vmul.f32 %v2031_v3, %v2659_v49 }
 0x366   : > { %2036 = vrsqrt.f32 %v1198_v33 }
 0x367   : > { %1243 = vst [vmem:[#allocation9 + $0x50] sm:$0xff] %v1227_v5  ;;  %v1182_v26 = vpop.xlane.xlu0 %1181 }
 0x368   : > { %v2033_v15 = vpop.eup %2032  ;;  %v1199_v19 = vmax.f32 %v1182_v26, 1e-24 }
 0x369   : > { %v1228_v14 = vmul.f32 %v2033_v15, %v2667_v52 }
 0x36a   : > { %2038 = vrsqrt.f32 %v1199_v19 }
 0x36b   : > { %1244 = vst [vmem:[#allocation9 + $0x58] sm:$0xff] %v1228_v14  ;;  %v1184_v50 = vpop.xlane.xlu1 %1183 }
 0x36c   : > { %v2035_v20 = vpop.eup %2034  ;;  %v1200_v35 = vmax.f32 %v1184_v50, 1e-24 }
 0x36d   : > { %v1229_v22 = vmul.f32 %v2035_v20, %v2673_v59 }
 0x36e   : > { %2040 = vrsqrt.f32 %v1200_v35 }
 0x36f   : > { %1245 = vst [vmem:[#allocation9 + $0x60] sm:$0xff] %v1229_v22 }
 0x370   : > { %v2037_v21 = vpop.eup %2036 }
 0x371   : > { %v1230_v49 = vmul.f32 %v2037_v21, %v2681_v8 }
 0x373   : > { %1246 = vst [vmem:[#allocation9 + $0x68] sm:$0xff] %v1230_v49 }
 0x374   : > { %v2039_v25 = vpop.eup %2038 }
 0x375   : > { %v1231_v29 = vmul.f32 %v2039_v25, %v2687_v13 }
 0x377   : > { %1247 = vst [vmem:[#allocation9 + $0x70] sm:$0xff] %v1231_v29 }
 0x378   : > { %v2041_v52 = vpop.eup %2040 }
 0x379   : > { %v1232_v6 = vmul.f32 %v2041_v52, %v2693_v24 }
 0x37b   : > { %1248 = vst [vmem:[#allocation9 + $0x78] sm:$0xff] %v1232_v6 }
 0x37c   : > { %2135 = shalt.err (!%p2132_p9)
}
 0x37d   : > { %s2136_s11 = scalar_lea.hbm %s2753_s4, 2048 }
 0x37e   : > { %p2137_p8 = scmp.ne.s32.totalorder %s2753_s4, %s2136_s11  ;;  %p2142_p2 = scmp.lt.u32.totalorder %s2136_s11, %s2753_s4 }
 0x380   : > { %p2138_p12 = pnand %p2137_p8, %p1969_p3 }
 0x382   : > { %p2139_p0 = pneg %p2138_p12 }
 0x384   : > { %p2144_p11 = pnand %p2142_p2, %p2139_p0 }
 0x386   : > { %2147 = shalt.err (!%p2144_p11)
}
 0x387   : > { %s2202_s5 = smov 128   ;;  %s2203_s6 = smov 8  }
 0x388   : > { %1954 = dma.vmem_to_hbm [thread:$0]  (%p1969_p3), %s1256_s30, 2048, %s2753_s4, [#allocation6], %s2202_s5, %s2202_s5, %s2203_s6  }
 0x389   : > { %2177 = dma.done.wait (%p1969_p3), [#allocation6], 2048  }
 0x38a   : > { %2179 = vsyncadd (%p1969_p3), [#allocation6], 4294965248 }
 0x38b PF: > { %p16_p13 = scmp.ge.s32.totalorder %s2274_s25, 5   ;;  %s2792_s15 = smov %s2186_s16 }
 0x38c   : > { %s2793_s16 = smov %s2190_s17  ;;  %s2794_s17 = smov %s2303_s14 }
 0x38d   : > { %s2795_s18 = smov %s2274_s25  ;;  %18 = sbr.rel (!%p16_p13) target bundleno = 5 (0x5), region = 89 }
 0x394   :  { %1271 = vsyncpa [#allocation5], 1 }
 0x395   :  { %1273 = vsyncpa [#allocation5 + $0x1], 1 }
 0x396   :  { %1274 = vsyncpa [#allocation8], 1 }
 0x397   :  { %1276 = vsyncpa [#allocation8 + $0x1], 1 }
 0x398   :  { %1277 = vsyncpa [#allocation6], 1 }
 0x399   :  { %1279 = vsyncpa [#allocation6 + $0x1], 1 }
 0x39a   :  { %1280 = vsyncmov [#allocation3] }
 0x39d   :  { %s1281_s19 = vpop.sfrf %1280 }
 0x39e   :  { %p1349_p3 = scmp.ne.s32.totalorder %s1281_s19, 0 }
 0x3a0   :  { %1285 = shalt.err (%p1349_p3)  }

</bundles_post_ra>
